<compile_context>
chip_gen: v7x
topology: tpu7x:2x2x1
jax: 0.10.0
libtpu: 0.0.40
codegen_flags: <defaults>
</compile_context>

<pallas_src>
import jax
import jax.numpy as jnp
from jax.experimental import pallas as pl
from jax.experimental.pallas import tpu as pltpu

# ----------------------------- config (small shapes) -----------------------------
N, C_IN, H, W = 2, 4, 16, 16       # batch, channels, spatial (NCHW like PyTorch)
C_OUT = 4                          # 1x1 conv output channels (same as target y)
NUM_HEADS = 2                      # model returns a list of NUM_HEADS outputs
HC = NUM_HEADS * C_OUT             # fused head*channel rows
ROWS = N * H * W                   # 512 -> lane axis (multiple of 128)
N_ELEMS = float(ROWS * C_OUT)      # per-head MSE 'mean' denominator (torch: N*C*H*W)


# --------------------------------- Pallas kernel ---------------------------------
def model_with_loss_kernel(x_ref, y_ref, w_ref, b_ref, out_ref, loss_ref):
    """Single invocation: fused heads, lane-dense (channels, ROWS) layout.

    x_ref   : (C_IN, ROWS)   transposed input
    y_ref   : (HC,  ROWS)    target, tiled across heads
    w_ref   : (HC,  C_IN)    stacked per-head W_h^T
    b_ref   : (HC,  1)       stacked per-head biases
    out_ref : (HC,  ROWS)    all heads' outputs (last dim 512 -> unmasked stores)
    loss_ref: (1, 1)         summed per-head MSE
    """
    # All heads in one matmul: (HC, C_IN) @ (C_IN, ROWS) -> (HC, ROWS), N=512 tile.
    out = jnp.dot(w_ref[...], x_ref[...],
                  preferred_element_type=jnp.float32) + b_ref[...]
    out_ref[...] = out.astype(out_ref.dtype)

    # Summed per-head MSE == sum of squared diffs over all fused rows / N_ELEMS
    # (y is tiled across heads; each head shares the same mean denominator).
    diff = out - y_ref[...]
    sq = diff * diff
    s_lane = jnp.sum(sq, axis=1, keepdims=True)                     # (HC, 1) lane reduce
    loss_ref[...] = jnp.sum(s_lane, axis=0, keepdims=True) * (1.0 / N_ELEMS)


# ----------------------------------- wrapper -------------------------------------
@jax.jit
def model_with_loss_forward(x_nchw, y_nchw, weights, biases):
    """Mirrors ModelWithLoss.forward: returns (outputs, loss, loss_stats)."""
    # NCHW -> channels-first flat (C, N*H*W): cheaper permute than NHWC round-trip.
    x_t = jnp.transpose(x_nchw, (1, 0, 2, 3)).reshape(C_IN, ROWS)
    y_t = jnp.transpose(y_nchw, (1, 0, 2, 3)).reshape(C_OUT, ROWS)
    y_tiled = jnp.tile(y_t, (NUM_HEADS, 1))                          # (HC, ROWS), ~16 KB
    w_t = jnp.transpose(weights, (0, 2, 1)).reshape(HC, C_IN)        # stacked W_h^T
    b_col = biases.reshape(HC, 1)

    cost = pl.CostEstimate(
        flops=2 * HC * C_IN * ROWS + 3 * HC * ROWS,
        transcendentals=0,
        bytes_accessed=4 * (C_IN * ROWS + 2 * HC * ROWS + HC * C_IN + HC + 1),
    )

    vmem = pl.BlockSpec(memory_space=pltpu.MemorySpace.VMEM)

    # Whole problem fits trivially in VMEM: no grid, whole arrays placed in VMEM
    # for the single invocation.
    out_t, loss = pl.pallas_call(
        model_with_loss_kernel,
        out_shape=(
            jax.ShapeDtypeStruct((HC, ROWS), jnp.float32),
            jax.ShapeDtypeStruct((1, 1), jnp.float32),
        ),
        in_specs=[vmem, vmem, vmem, vmem],
        out_specs=(vmem, vmem),
        cost_estimate=cost,
    )(x_t, y_tiled, w_t, b_col)

    # (HC, ROWS) -> (NUM_HEADS, N, C_OUT, H, W) with ONE batched reshape+transpose,
    # then unstack into the Python list the PyTorch model would return.
    out5 = jnp.transpose(out_t.reshape(NUM_HEADS, C_OUT, N, H, W), (0, 2, 1, 3, 4))
    outputs = [out5[h] for h in range(NUM_HEADS)]

    loss_scalar = loss[0, 0]
    loss_stats = {"loss": loss_scalar}
    return outputs, loss_scalar, loss_stats


# -------------------------------- pure-JAX reference ------------------------------
def reference_forward(x_nchw, y_nchw, weights, biases):
    outs = []
    loss = 0.0
    for h in range(NUM_HEADS):
        # 1x1 conv in NCHW: out[n,co,i,j] = sum_ci x[n,ci,i,j] * W_h[ci,co] + b_h[co]
        o = jnp.einsum("ncij,cd->ndij", x_nchw, weights[h]) \
            + biases[h][None, :, None, None]
        outs.append(o)
        loss = loss + jnp.mean((o - y_nchw) ** 2)
    return outs, loss


# ------------------------------------- main ---------------------------------------
if __name__ == "__main__":
    key = jax.random.PRNGKey(0)
    kx, ky, kw, kb = jax.random.split(key, 4)

    # Deterministic inputs and parameters (synthetic; no checkpoint loading).
    x = jax.random.normal(kx, (N, C_IN, H, W), dtype=jnp.float32)        # NCHW input
    y = jax.random.normal(ky, (N, C_OUT, H, W), dtype=jnp.float32)       # NCHW target
    weights = 0.1 * jax.random.normal(kw, (NUM_HEADS, C_IN, C_OUT), dtype=jnp.float32)
    biases = 0.1 * jax.random.normal(kb, (NUM_HEADS, C_OUT), dtype=jnp.float32)

    outputs, loss, loss_stats = model_with_loss_forward(x, y, weights, biases)
    jax.block_until_ready(loss)
    for o in outputs:
        jax.block_until_ready(o)

    # Correctness check against pure-JAX reference.
    ref_outs, ref_loss = reference_forward(x, y, weights, biases)
    assert jnp.allclose(loss, ref_loss, rtol=1e-5, atol=1e-5), (loss, ref_loss)
    for o, ro in zip(outputs, ref_outs):
        assert jnp.allclose(o, ro, rtol=1e-5, atol=1e-5)
    assert jnp.allclose(loss_stats["loss"], ref_loss, rtol=1e-5, atol=1e-5)

    print("KERNEL_OK")
</pallas_src>

<mosaic_0001>
module attributes {stable_mosaic.version = 11 : i64} {
  func.func @model_with_loss_kernel(%arg0: memref<4x512xf32, #tpu.memory_space<vmem>>, %arg1: memref<8x512xf32, #tpu.memory_space<vmem>>, %arg2: memref<8x4xf32, #tpu.memory_space<vmem>>, %arg3: memref<8x1xf32, #tpu.memory_space<vmem>>, %arg4: memref<8x512xf32, #tpu.memory_space<vmem>>, %arg5: memref<1x1xf32, #tpu.memory_space<vmem>>) attributes {dimension_semantics = [], scalar_prefetch = 0 : i64, scratch_operands = 0 : i64, tpu.core_type = #tpu.core_type<tc>} {
    %c0 = arith.constant 0 : index
    %c0_0 = arith.constant 0 : index
    %0 = vector.load %arg2[%c0, %c0_0] : memref<8x4xf32, #tpu.memory_space<vmem>>, vector<8x4xf32>
    %c0_1 = arith.constant 0 : index
    %c0_2 = arith.constant 0 : index
    %1 = vector.load %arg0[%c0_1, %c0_2] : memref<4x512xf32, #tpu.memory_space<vmem>>, vector<4x512xf32>
    %cst = arith.constant dense<0.000000e+00> : vector<8x512xf32>
    %2 = tpu.matmul %0, %1, %cst {dimension_numbers = #tpu.dot_dimension_numbers<[1], [0], [0], [1], [0, 0, 1, 1], [], []>} : vector<8x4xf32>, vector<4x512xf32>, vector<8x512xf32> -> vector<8x512xf32>
    %c0_3 = arith.constant 0 : index
    %c0_4 = arith.constant 0 : index
    %3 = vector.load %arg3[%c0_3, %c0_4] : memref<8x1xf32, #tpu.memory_space<vmem>>, vector<8x1xf32>
    %4 = vector.broadcast %3 : vector<8x1xf32> to vector<8x512xf32>
    %5 = arith.addf %2, %4 : vector<8x512xf32>
    %c0_5 = arith.constant 0 : index
    %c0_6 = arith.constant 0 : index
    %6 = vector.load %arg4[%c0_5, %c0_6] : memref<8x512xf32, #tpu.memory_space<vmem>>, vector<8x512xf32>
    tpu.vector_store %arg4[%c0_5, %c0_6], %5 {strides = array<i32>} : memref<8x512xf32, #tpu.memory_space<vmem>>, vector<8x512xf32>,
    %c0_7 = arith.constant 0 : index
    %c0_8 = arith.constant 0 : index
    %7 = vector.load %arg1[%c0_7, %c0_8] : memref<8x512xf32, #tpu.memory_space<vmem>>, vector<8x512xf32>
    %8 = arith.subf %5, %7 : vector<8x512xf32>
    %9 = arith.mulf %8, %8 : vector<8x512xf32>
    %cst_9 = arith.constant dense<0.000000e+00> : vector<8xf32>
    %10 = vector.multi_reduction <add>, %9, %cst_9 [1] : vector<8x512xf32> to vector<8xf32>
    %11 = vector.shape_cast %10 : vector<8xf32> to vector<8x1xf32>
    %cst_10 = arith.constant dense<0.000000e+00> : vector<1xf32>
    %12 = vector.multi_reduction <add>, %11, %cst_10 [0] : vector<8x1xf32> to vector<1xf32>
    %13 = vector.shape_cast %12 : vector<1xf32> to vector<1x1xf32>
    %cst_11 = arith.constant 4.8828125E-4 : f32
    %14 = vector.broadcast %cst_11 : f32 to vector<1x1xf32>
    %15 = arith.mulf %13, %14 : vector<1x1xf32>
    %c0_12 = arith.constant 0 : index
    %c0_13 = arith.constant 0 : index
    %16 = vector.load %arg5[%c0_12, %c0_13] : memref<1x1xf32, #tpu.memory_space<vmem>>, vector<1x1xf32>
    tpu.vector_store %arg5[%c0_12, %c0_13], %15 {strides = array<i32>} : memref<1x1xf32, #tpu.memory_space<vmem>>, vector<1x1xf32>,
    return
  }
}

</mosaic_0001>

<bundles_post_ra>
// kernel: tile.7
= control target key start
LH: loop header
LB: loop body
LE: loop exit
PB: predicated region body
PF: predicated region fallthrough
CT: control target
= control target key end

     0   :  { %s148_s0 = inlined_call_operand.vmem [shape: f32[2,4,512], index: 0, kind: input, shape index: {}]   ;;  %s149_s1 = inlined_call_operand.vmem [shape: f32[8,512], index: 1, kind: output, shape index: {}]  }
   0x1   :  { %v76_v0 = vld [vmem:[%s148_s0 + $0x1c] sm:$0xf]  ;;  %v77_v1 = vld [vmem:[%s148_s0 + $0x18] sm:$0xf]  ;;  %v78_v2 = vld [vmem:[%s148_s0 + $0x14] sm:$0xf] }
   0x2   :  { %8 = vst [vmem:[#allocation0 + $0x38] sm:$0xf] %v76_v0  ;;  %13 = vst [vmem:[#allocation0 + $0x30] sm:$0xf] %v77_v1  ;;  %v79_v3 = vld [vmem:[%s148_s0 + $0x10] sm:$0xf] }
   0x3   :  { %18 = vst [vmem:[#allocation0 + $0x28] sm:$0xf] %v78_v2  ;;  %v80_v4 = vld [vmem:[%s148_s0 + $0xc] sm:$0xf]  ;;  %v81_v5 = vld [vmem:[%s148_s0 + $0x8] sm:$0xf] }
   0x4   :  { %23 = vst [vmem:[#allocation0 + $0x20] sm:$0xf] %v79_v3  ;;  %28 = vst [vmem:[#allocation0 + $0x18] sm:$0xf] %v80_v4  ;;  %v82_v6 = vld [vmem:[%s148_s0 + $0x4] sm:$0xf] }
   0x5   :  { %33 = vst [vmem:[#allocation0 + $0x10] sm:$0xf] %v81_v5  ;;  %v38_v7 = vld [vmem:[%s148_s0] sm:$0xf]  ;;  %37 = vst [vmem:[#allocation0 + $0x8] sm:$0xf] %v82_v6 }
   0x6   :  { %39 = vst [vmem:[#allocation0] sm:$0xf] %v38_v7 }
   0x9   :  { %v63_v9 = vld [vmem:[#allocation0 + $0x30] sm:$0xf]   ;;  %v67_v10 = vld [vmem:[#allocation0 + $0x38] sm:$0xf]  }
   0xa   :  { %v59_v8 = vld [vmem:[#allocation0 + $0x28] sm:$0xf]   ;;  %88 = vst [vmem:[%s149_s1 + $0x14] sm:$0xf] %v63_v9   ;;  %89 = vst [vmem:[%s149_s1 + $0x1c] sm:$0xf] %v67_v10  }
   0xb   :  { %v51_v12 = vld [vmem:[#allocation0 + $0x18] sm:$0xf]   ;;  %v55_v13 = vld [vmem:[#allocation0 + $0x20] sm:$0xf]   ;;  %87 = vst [vmem:[%s149_s1 + $0xc] sm:$0xf] %v59_v8  }
   0xc   :  { %v47_v11 = vld [vmem:[#allocation0 + $0x10] sm:$0xf]   ;;  %v43_v15 = vld [vmem:[#allocation0 + $0x8] sm:$0xf]   ;;  %85 = vst [vmem:[%s149_s1 + $0x18] sm:$0xf] %v51_v12  }
   0xd   :  { %v40_v14 = vld [vmem:[#allocation0] sm:$0xf]   ;;  %84 = vst [vmem:[%s149_s1 + $0x10] sm:$0xf] %v47_v11   ;;  %86 = vst [vmem:[%s149_s1 + $0x4] sm:$0xf] %v55_v13  }
   0xe   :  { %41 = vst [vmem:[%s149_s1] sm:$0xf] %v40_v14   ;;  %83 = vst [vmem:[%s149_s1 + $0x8] sm:$0xf] %v43_v15  }

// kernel: model_with_loss_forward.1
= control target key start
LH: loop header
LB: loop body
LE: loop exit
PB: predicated region body
PF: predicated region fallthrough
CT: control target
= control target key end

     0   :  { %vm37_vm0 = vcmask 1043456   ;;  %v272_v4 = vmov 0.0   ;;  %s357_s0 = inlined_call_operand.vmem [shape: f32[4,512], index: 0, kind: input, shape index: {}]   ;;  %s358_s1 = inlined_call_operand.vmem [shape: f32[8,512], index: 1, kind: input, shape index: {}]   ;;  %s359_s2 = inlined_call_operand.vmem [shape: f32[8,4], index: 2, kind: input, shape index: {}]   ;;  %s360_s3 = inlined_call_operand.vmem [shape: f32[8,1], index: 3, kind: input, shape index: {}]   ;;  %s361_s4 = inlined_call_operand.vmem [shape: f32[8,512], index: 4, kind: output, shape index: {0}]   ;;  %s362_s5 = inlined_call_operand.hbm [shape: f32[1,1], index: 5, kind: output, shape index: {1}]  }
   0x1   :  { %v21_v0 = vld [vmem:[%s357_s0] sm:$0xff]  ;;  %v22_v1 = vld [vmem:[%s357_s0 + $0x8] sm:$0xff]  ;;  %110 = vmatprep.mubr.f32.mxu0 %v272_v4  ;;  %181 = vmatprep.mubr.f32.mxu1 %v272_v4 }
   0x2   :  { %v31_v2 = vcombine.high %v21_v0, %v21_v0  ;;  %v32_v3 = vcombine.high %v22_v1, %v22_v1 }
   0x3   :  { %11 = vsyncpa [#allocation3], 0  ;;  %v20_v5 = vld [vmem:[%s359_s2] sm:$0xff]  ;;  %vm33_vm1 = vcmask 31744   ;;  %v273_v6 = vmov 0   ;;  %v194_v14 = vld [vmem:[%s358_s1 + $0x10] sm:$0xff] }
   0x4   :  { %245 = vset.pattern.permute.xlu0 %v273_v6  ;;  %236 = vmatprep.subr.msk.mxu0 %vm37_vm0, %v31_v2  ;;  %v23_v7 = vld [vmem:[%s360_s3] sm:$0xff]  ;;  %v193_v16 = vld [vmem:[%s358_s1 + $0x8] sm:$0xff]  ;;  %v195_v21 = vld [vmem:[%s358_s1 + $0x18] sm:$0xff]  ;;  %vm216_vm2 = vcmask 0  }
   0x5   :  { %239 = vmatprep.subr.msk.mxu1 %vm37_vm0, %v32_v3  ;;  %237 = vmatpush1.msk.msra.mxu0 %vm37_vm0, %v21_v0  ;;  %v192_v10 = vld [vmem:[%s358_s1] sm:$0xff]  ;;  %s274_s1 = smov [#allocation2]  }
   0x6   :  { %240 = vmatpush1.msk.msra.mxu1 %vm37_vm0, %v22_v1  ;;  %238 = vmatmul.mubr.msk.f32.vlgmr.msra.gmra.mrb[0].mxu0 %vm33_vm1, %v20_v5  ;;  %s226_s14 = sshll.u32 %s274_s1, 4  ;;  %s227_s14 = int_to_ptr.vmem [resolvable:$true] %s226_s14 }
   0x7   :  { %241 = vmatmul.mubr.msk.f32.vlgmr.msra.gmra.mrb[0].mxu1 %vm33_vm1, %v20_v5  ;;  %26 = vperm.xlu0 %245, %v23_v7   ;;  %s252_s15 = scalar_lea.vmem %s227_s14, 32  ;;  %p253_p1 = scmp.lt.s32.totalorder %s227_s14, %s227_s14 }
  0x86   :  { %v27_v8 = vpop.permute.xlu0 %26 }
  0xd9   :  { %v112_v9 = vpop.f32.mrb[0].mxu0 }
  0xda   :  { %v183_v11 = vpop.f32.mrb[0].mxu1  ;;  %v113_v12 = vadd.f32 %v112_v9, %v27_v8  ;;  %v114_v15 = vpop.f32.mrb[1].mxu0 }
  0xdb   :  { %v184_v13 = vadd.f32 %v183_v11, %v27_v8  ;;  %v185_v17 = vpop.f32.mrb[1].mxu1  ;;  %v115_v18 = vadd.f32 %v114_v15, %v27_v8 }
  0xdc   :  { %v186_v19 = vadd.f32 %v185_v17, %v27_v8  ;;  %188 = vst [vmem:[%s361_s4] sm:$0xff] %v113_v12  ;;  %v196_v20 = vsub.f32 %v113_v12, %v192_v10 }
  0xdd   :  { %190 = vst [vmem:[%s361_s4 + $0x10] sm:$0xff] %v184_v13  ;;  %v198_v22 = vsub.f32 %v184_v13, %v194_v14  ;;  %189 = vst [vmem:[%s361_s4 + $0x8] sm:$0xff] %v115_v18  ;;  %v197_v23 = vsub.f32 %v115_v18, %v193_v16 }
  0xde   :  { %191 = vst [vmem:[%s361_s4 + $0x18] sm:$0xff] %v186_v19  ;;  %v200_v24 = vmul.f32 %v196_v20, %v196_v20  ;;  %v199_v26 = vsub.f32 %v186_v19, %v195_v21  ;;  %s248_s4 = scalar_lea.vmem %s227_s14, 16 }
  0xdf   :  { %v201_v25 = vmul.f32 %v197_v23, %v197_v23  ;;  %v202_v27 = vmul.f32 %v198_v22, %v198_v22  ;;  %p249_p0 = scmp.ne.s32.totalorder %s227_s14, %s248_s4  ;;  %p254_p2 = scmp.lt.s32.totalorder %s252_s15, %s248_s4 }
  0xe0   :  { %v203_v29 = vmul.f32 %v199_v26, %v199_v26 }
  0xe1   :  { %v204_v28 = vadd.f32 %v201_v25, %v200_v24  ;;  %p255_p3 = por %p254_p2, %p253_p1 }
  0xe3   :  { %v205_v30 = vadd.f32 %v204_v28, %v202_v27  ;;  %p256_p4 = pnand %p255_p3, %p249_p0 }
  0xe5   :  { %v206_v31 = vadd.f32 %v205_v30, %v203_v29 }
  0xe7   :  { %207 = vadd.xlane.f32.xlu0 %v206_v31 }
 0x174   :  { %v208_v32 = vpop.xlane.xlu0 %207 }
 0x175   :  { %v209_v33 = vrot.slane %v208_v32, 4 }
 0x177   :  { %v210_v34 = vadd.f32 %v209_v33, %v208_v32 }
 0x179   :  { %v211_v35 = vrot.slane %v210_v34, 2 }
 0x17b   :  { %v212_v36 = vadd.f32 %v211_v35, %v210_v34 }
 0x17d   :  { %v213_v37 = vrot.slane %v212_v36, 1 }
 0x17f   :  { %v214_v38 = vadd.f32 %v213_v37, %v212_v36 }
 0x181   :  { %v215_v39 = vmul.f32 0.00048828125, %v214_v38 }
 0x183   :  { %217 = vst.msk [vmem:[#allocation2] sm:$0x1] %vm216_vm2, %v215_v39 }
 0x184   :  { %259 = shalt.err (!%p256_p4)
}
 0x185   :  { %s260_s18 = scalar_lea.hbm %s362_s5, 16 }
 0x186   :  { %p261_p5 = scmp.ne.s32.totalorder %s362_s5, %s260_s18  ;;  %p264_p6 = scmp.lt.u32.totalorder %s260_s18, %s362_s5 }
 0x188   :  { %p266_p7 = pnand %p264_p6, %p261_p5 }
 0x18a   :  { %269 = shalt.err (!%p266_p7)
}
 0x18b   :  { %229 = dma.vmem_to_hbm [thread:$0]  %s227_s14, 16, %s362_s5, [#allocation3]  }
 0x18c   :  { %270 = dma.done.wait [#allocation3], 16  }
 0x18d   :  { %271 = vsyncadd [#allocation3], 4294967280 }
 0x18e   :  { %235 = vsyncpa [#allocation3], 1 }

</bundles_post_ra>
